<compile_context>
chip_gen: v6e
topology: v6e:2x2x1
jax: 0.10.0
libtpu: 0.0.40
codegen_flags: <defaults>
</compile_context>

<pallas_src>
import functools

import jax
import jax.numpy as jnp
from jax.experimental import pallas as pl
from jax.experimental.pallas import tpu as pltpu


def _tconv_relu_kernel(x_ref, ht_ref, hb_ref, w_ref, m_ref, b_ref, o_ref, xp_ref,
                       *, width, tile_h, guard_l):
    # x_ref:  (1, Cin, TH*W)    flattened bf16 input rows of this tile
    # ht_ref: (1, 1, Cin, W)    bf16 halo row above the tile (zeros at image top)
    # hb_ref: (1, 1, Cin, W)    bf16 halo row below the tile (zeros at image bottom)
    # w_ref:  (9, Cout, Cin)    bf16 per-tap weights (tap = kh*3 + kw)
    # m_ref:  (2, TH*W)         bf16 column masks: [0] kills c==0, [1] kills c==W-1
    # b_ref:  (Cout, 1)         f32 bias
    # o_ref:  (1, Cout, TH*W)   f32 output (lane-dense)
    # xp_ref: (Cin, guard_l + (TH+2)*W + guard_r)  bf16 haloed-window scratch
    cin = x_ref.shape[1]
    thw = x_ref.shape[2]
    xpw = xp_ref.shape[1]
    win = (tile_h + 2) * width
    base = guard_l + width                     # lane-aligned start of the tile rows

    # Zero ONLY the guard strips (everything in [guard_l, guard_l+win) is
    # overwritten below). Cheap enough to redo every grid step.
    xp_ref[:, 0:guard_l] = jnp.zeros((cin, guard_l), xp_ref.dtype)
    xp_ref[:, guard_l + win:] = jnp.zeros((cin, xpw - guard_l - win), xp_ref.dtype)

    # Assemble the haloed, flattened window: [top halo row | TH tile rows | bottom halo row].
    xp_ref[:, guard_l:guard_l + width] = ht_ref[0, 0]
    xp_ref[:, base:base + thw] = x_ref[0]                       # aligned lane-dense store
    xp_ref[:, base + thw:base + thw + width] = hb_ref[0, 0]

    m_kw0 = m_ref[0:1, :]                     # hoisted out of the tap loop
    m_kw2 = m_ref[1:2, :]

    # 9 taps -> 9 chained bf16 MXU matmuls accumulated in f32 (no im2col scratch).
    acc = None
    for kh in range(3):
        for kw in range(3):
            d = (kh - 1) * width + (kw - 1)
            piece = xp_ref[:, base + d:base + d + thw]          # (Cin, TH*W) bf16
            if kw == 0:                                         # kill column wraparound
                piece = piece * m_kw0
            elif kw == 2:
                piece = piece * m_kw2
            part = jnp.dot(w_ref[kh * 3 + kw], piece,
                           preferred_element_type=jnp.float32)  # (Cout, TH*W) f32
            acc = part if acc is None else acc + part

    acc = acc + b_ref[...]                                      # f32 bias
    acc = jnp.where(acc >= 0, acc, 0.1 * acc)                   # LeakyReLU(0.1), f32
    o_ref[0] = acc.astype(o_ref.dtype)                          # dense (Cout, TH*W) store


def _pick_vmem_limit_bytes():
    """Generation-aware scoped-VMEM limit with headroom under physical VMEM."""
    try:
        cap = pltpu.get_tpu_info().vmem_capacity_bytes
    except Exception:  # conservative fallback if the query is unavailable
        cap = 64 * 1024 * 1024
    return int(min(cap * 3 // 4, 100 * 1024 * 1024))   # ~48 MiB v7x, ~96 MiB v5e/v6e


def _choose_tile_h(H, W, Cin, Cout, budget_bytes):
    """Largest TH with TH | H and lane-dense TH*W whose per-step VMEM fits the budget."""
    def est(th):
        thw = th * W
        return (2 * Cin * thw * 2                      # double-buffered bf16 input block
                + 2 * Cout * thw * 4                   # double-buffered f32 output block
                + Cin * ((th + 2) * W + 256) * 2       # haloed-window scratch (bf16)
                + Cout * thw * 4                       # f32 accumulator working set
                + 2 * (9 * Cout * Cin + 2 * thw) * 2   # weights + masks (double-buffered)
                + 2 * Cout * 4                         # bias
                + 4 * 2 * Cin * W * 2)                 # halo-row blocks
    cands = sorted((th for th in range(1, H + 1)
                    if H % th == 0 and (th == H or (th * W) % 128 == 0)),
                   reverse=True)
    for th in cands:
        if est(th) <= budget_bytes:
            return th
    return cands[-1]


@jax.jit
def tran_conv_relu(x_nchw, wt, bias):
    """ConvTranspose2d(k=3, s=1, p=1, bias=True) + LeakyReLU(0.1).

    x_nchw: (N, Cin, H, W) f32
    wt:     (Cin, Cout, 3, 3)  PyTorch ConvTranspose2d weight layout
    bias:   (Cout,)
    returns (N, Cout, H, W) f32
    """
    N, Cin, H, W = x_nchw.shape
    Cout = wt.shape[1]
    HW = H * W

    vmem_limit = _pick_vmem_limit_bytes()
    TH = _choose_tile_h(H, W, Cin, Cout, int(vmem_limit * 0.7))
    T = H // TH
    THW = TH * W
    GUARD_L = 128 - (W % 128) if (W % 128) else 128    # makes the tile-row store lane-aligned
    GUARD_R = 128
    XPW = GUARD_L + (TH + 2) * W + GUARD_R

    # ConvTranspose2d(s=1, p=1, k=3) == Conv2d(s=1, p=1, k=3) with
    #   w_conv[o, i, kh, kw] = wt[i, o, 2-kh, 2-kw]
    w_conv = jnp.transpose(wt[:, :, ::-1, ::-1], (1, 0, 2, 3))          # (Cout, Cin, 3, 3)
    w_taps = jnp.transpose(w_conv, (2, 3, 0, 1)).reshape(9, Cout, Cin)  # [tap, o, i]
    w_taps = w_taps.astype(jnp.bfloat16)

    # Column masks (rows are handled by the zero/neighbour halos).  Same for every tile.
    col = jnp.tile(jnp.arange(W, dtype=jnp.int32), TH)                  # (TH*W,)
    masks = jnp.stack([col >= 1, col <= W - 2], axis=0).astype(jnp.bfloat16)  # (2, TH*W)

    xb = x_nchw.astype(jnp.bfloat16)                   # bf16 MXU operand (halves DMA)
    x_flat = xb.reshape(N, Cin, HW)                    # free (contiguous) reshape

    # Per-tile halo rows: row above / below each TH-row tile (zeros at the image edges).
    zero_row = jnp.zeros((N, Cin, 1, W), jnp.bfloat16)
    if T > 1:
        top_rows = xb[:, :, TH - 1::TH, :][:, :, :T - 1, :]
        bot_rows = xb[:, :, TH::TH, :][:, :, :T - 1, :]
        top = jnp.concatenate([zero_row, top_rows], axis=2)             # (N, Cin, T, W)
        bot = jnp.concatenate([bot_rows, zero_row], axis=2)
    else:
        top = zero_row
        bot = zero_row
    halo_top = jnp.transpose(top, (0, 2, 1, 3))        # (N, T, Cin, W)
    halo_bot = jnp.transpose(bot, (0, 2, 1, 3))

    b2 = bias.reshape(Cout, 1).astype(jnp.float32)

    kernel = functools.partial(_tconv_relu_kernel, width=W, tile_h=TH, guard_l=GUARD_L)

    out_flat = pl.pallas_call(
        kernel,
        out_shape=jax.ShapeDtypeStruct((N, Cout, HW), jnp.float32),
        grid_spec=pltpu.PrefetchScalarGridSpec(
            num_scalar_prefetch=0,
            grid=(N, T),
            in_specs=[
                pl.BlockSpec((1, Cin, THW), lambda n, t: (n, 0, t)),
                pl.BlockSpec((1, 1, Cin, W), lambda n, t: (n, t, 0, 0)),
                pl.BlockSpec((1, 1, Cin, W), lambda n, t: (n, t, 0, 0)),
                pl.BlockSpec((9, Cout, Cin), lambda n, t: (0, 0, 0)),
                pl.BlockSpec((2, THW), lambda n, t: (0, 0)),
                pl.BlockSpec((Cout, 1), lambda n, t: (0, 0)),
            ],
            out_specs=pl.BlockSpec((1, Cout, THW), lambda n, t: (n, 0, t)),
            scratch_shapes=[
                pltpu.VMEM((Cin, XPW), jnp.bfloat16),   # haloed flattened input window
            ],
        ),
        compiler_params=pltpu.CompilerParams(
            dimension_semantics=("parallel", "parallel"),
            vmem_limit_bytes=vmem_limit,
        ),
    )(x_flat, halo_top, halo_bot, w_taps, masks, b2)

    return out_flat.reshape(N, Cout, H, W)             # free (contiguous) reshape


def reference(x_nchw, wt, bias):
    """Pure-JAX f32 reference: stride-1 transposed conv as equivalent conv + LeakyReLU."""
    Cout = wt.shape[1]
    w_conv = jnp.transpose(wt[:, :, ::-1, ::-1], (1, 0, 2, 3))  # (Cout, Cin, 3, 3)
    y = jax.lax.conv_general_dilated(
        x_nchw, w_conv, window_strides=(1, 1),
        padding=((1, 1), (1, 1)),
        dimension_numbers=("NCHW", "OIHW", "NCHW"))
    y = y + bias.reshape(1, Cout, 1, 1)
    return jnp.where(y >= 0, y, 0.1 * y)


if __name__ == "__main__":
    key = jax.random.PRNGKey(0)
    k_x, k_w, k_b = jax.random.split(key, 3)

    N, Cin, Cout, H, W = 2, 4, 8, 16, 16

    x = jax.random.normal(k_x, (N, Cin, H, W), dtype=jnp.float32)
    # ConvTranspose2d weight shape: (in_channels, out_channels, kH, kW)
    bound = 1.0 / (Cin * 3 * 3) ** 0.5
    wt = jax.random.uniform(k_w, (Cin, Cout, 3, 3), jnp.float32, -bound, bound)
    bias = jax.random.uniform(k_b, (Cout,), jnp.float32, -bound, bound)

    out = jax.block_until_ready(tran_conv_relu(x, wt, bias))
    ref = jax.block_until_ready(reference(x, wt, bias))

    assert out.shape == (N, Cout, H, W)
    # bf16 matmul operands with f32 accumulation -> loosened tolerance vs f32 reference.
    assert jnp.allclose(out, ref, atol=5e-2, rtol=5e-2), "mismatch vs reference"

    print("KERNEL_OK")
</pallas_src>

<mosaic_0001>
module attributes {stable_mosaic.version = 11 : i64} {
  func.func @_tconv_relu_kernel(%arg0: i32, %arg1: i32, %arg2: memref<1x4x256xbf16, #tpu.memory_space<vmem>>, %arg3: memref<1x1x4x16xbf16, #tpu.memory_space<vmem>>, %arg4: memref<1x1x4x16xbf16, #tpu.memory_space<vmem>>, %arg5: memref<9x8x4xbf16, #tpu.memory_space<vmem>>, %arg6: memref<2x256xbf16, #tpu.memory_space<vmem>>, %arg7: memref<8x1xf32, #tpu.memory_space<vmem>>, %arg8: memref<1x8x256xf32, #tpu.memory_space<vmem>>, %arg9: memref<4x528xbf16, #tpu.memory_space<vmem>>) attributes {dimension_semantics = [#tpu.dimension_semantics<parallel>, #tpu.dimension_semantics<parallel>], iteration_bounds = array<i64: 2, 1>, scalar_prefetch = 0 : i64, scratch_operands = 1 : i64, tpu.core_type = #tpu.core_type<tc>, window_params = [{transform_indices = @transform_0, window_bounds = array<i64: 1, 4, 256>}, {transform_indices = @transform_1, window_bounds = array<i64: 1, 1, 4, 16>}, {transform_indices = @transform_2, window_bounds = array<i64: 1, 1, 4, 16>}, {pipeline_mode = #tpu.pipeline_mode<synchronous>, transform_indices = @transform_3, window_bounds = array<i64: 9, 8, 4>}, {pipeline_mode = #tpu.pipeline_mode<synchronous>, transform_indices = @transform_4, window_bounds = array<i64: 2, 256>}, {pipeline_mode = #tpu.pipeline_mode<synchronous>, transform_indices = @transform_5, window_bounds = array<i64: 8, 1>}, {transform_indices = @transform_6, window_bounds = array<i64: 1, 8, 256>}]} {
    %cst = arith.constant 0.000000e+00 : bf16
    %0 = vector.broadcast %cst : bf16 to vector<4x112xbf16>
    %c0 = arith.constant 0 : index
    %c0_0 = arith.constant 0 : index
    %1 = vector.load %arg9[%c0, %c0_0] : memref<4x528xbf16, #tpu.memory_space<vmem>>, vector<4x112xbf16>
    tpu.vector_store %arg9[%c0, %c0_0], %0 {strides = array<i32>} : memref<4x528xbf16, #tpu.memory_space<vmem>>, vector<4x112xbf16>,
    %cst_1 = arith.constant 0.000000e+00 : bf16
    %2 = vector.broadcast %cst_1 : bf16 to vector<4x128xbf16>
    %c0_2 = arith.constant 0 : index
    %c400 = arith.constant 400 : index
    %3 = vector.load %arg9[%c0_2, %c400] : memref<4x528xbf16, #tpu.memory_space<vmem>>, vector<4x128xbf16>
    tpu.vector_store %arg9[%c0_2, %c400], %2 {strides = array<i32>} : memref<4x528xbf16, #tpu.memory_space<vmem>>, vector<4x128xbf16>,
    %c0_3 = arith.constant 0 : index
    %c0_4 = arith.constant 0 : index
    %c0_5 = arith.constant 0 : index
    %c0_6 = arith.constant 0 : index
    %4 = vector.load %arg3[%c0_3, %c0_4, %c0_5, %c0_6] : memref<1x1x4x16xbf16, #tpu.memory_space<vmem>>, vector<1x1x4x16xbf16>
    %5 = vector.shape_cast %4 : vector<1x1x4x16xbf16> to vector<4x16xbf16>
    %c0_7 = arith.constant 0 : index
    %c112 = arith.constant 112 : index
    %6 = vector.load %arg9[%c0_7, %c112] : memref<4x528xbf16, #tpu.memory_space<vmem>>, vector<4x16xbf16>
    tpu.vector_store %arg9[%c0_7, %c112], %5 {strides = array<i32>} : memref<4x528xbf16, #tpu.memory_space<vmem>>, vector<4x16xbf16>,
    %c0_8 = arith.constant 0 : index
    %c0_9 = arith.constant 0 : index
    %c0_10 = arith.constant 0 : index
    %7 = vector.load %arg2[%c0_8, %c0_9, %c0_10] : memref<1x4x256xbf16, #tpu.memory_space<vmem>>, vector<1x4x256xbf16>
    %8 = vector.shape_cast %7 : vector<1x4x256xbf16> to vector<4x256xbf16>
    %c0_11 = arith.constant 0 : index
    %c128 = arith.constant 128 : index
    %9 = vector.load %arg9[%c0_11, %c128] : memref<4x528xbf16, #tpu.memory_space<vmem>>, vector<4x256xbf16>
    tpu.vector_store %arg9[%c0_11, %c128], %8 {strides = array<i32>} : memref<4x528xbf16, #tpu.memory_space<vmem>>, vector<4x256xbf16>,
    %c0_12 = arith.constant 0 : index
    %c0_13 = arith.constant 0 : index
    %c0_14 = arith.constant 0 : index
    %c0_15 = arith.constant 0 : index
    %10 = vector.load %arg4[%c0_12, %c0_13, %c0_14, %c0_15] : memref<1x1x4x16xbf16, #tpu.memory_space<vmem>>, vector<1x1x4x16xbf16>
    %11 = vector.shape_cast %10 : vector<1x1x4x16xbf16> to vector<4x16xbf16>
    %c0_16 = arith.constant 0 : index
    %c384 = arith.constant 384 : index
    %12 = vector.load %arg9[%c0_16, %c384] : memref<4x528xbf16, #tpu.memory_space<vmem>>, vector<4x16xbf16>
    tpu.vector_store %arg9[%c0_16, %c384], %11 {strides = array<i32>} : memref<4x528xbf16, #tpu.memory_space<vmem>>, vector<4x16xbf16>,
    %c0_17 = arith.constant 0 : index
    %c0_18 = arith.constant 0 : index
    %13 = vector.load %arg6[%c0_17, %c0_18] : memref<2x256xbf16, #tpu.memory_space<vmem>>, vector<1x256xbf16>
    %c1 = arith.constant 1 : index
    %c0_19 = arith.constant 0 : index
    %14 = vector.load %arg6[%c1, %c0_19] : memref<2x256xbf16, #tpu.memory_space<vmem>>, vector<1x256xbf16>
    %c0_20 = arith.constant 0 : index
    %c111 = arith.constant 111 : index
    %15 = vector.load %arg9[%c0_20, %c111] : memref<4x528xbf16, #tpu.memory_space<vmem>>, vector<4x256xbf16>
    %16 = vector.broadcast %13 : vector<1x256xbf16> to vector<4x256xbf16>
    %17 = arith.mulf %15, %16 : vector<4x256xbf16>
    %c0_21 = arith.constant 0 : index
    %c0_22 = arith.constant 0 : index
    %c0_23 = arith.constant 0 : index
    %18 = vector.load %arg5[%c0_21, %c0_22, %c0_23] : memref<9x8x4xbf16, #tpu.memory_space<vmem>>, vector<1x8x4xbf16>
    %19 = vector.shape_cast %18 : vector<1x8x4xbf16> to vector<8x4xbf16>
    %cst_24 = arith.constant dense<0.000000e+00> : vector<8x256xf32>
    %20 = tpu.matmul %19, %17, %cst_24 {dimension_numbers = #tpu.dot_dimension_numbers<[1], [0], [0], [1], [0, 0, 1, 1], [], []>} : vector<8x4xbf16>, vector<4x256xbf16>, vector<8x256xf32> -> vector<8x256xf32>
    %c0_25 = arith.constant 0 : index
    %c112_26 = arith.constant 112 : index
    %21 = vector.load %arg9[%c0_25, %c112_26] : memref<4x528xbf16, #tpu.memory_space<vmem>>, vector<4x256xbf16>
    %c1_27 = arith.constant 1 : index
    %c0_28 = arith.constant 0 : index
    %c0_29 = arith.constant 0 : index
    %22 = vector.load %arg5[%c1_27, %c0_28, %c0_29] : memref<9x8x4xbf16, #tpu.memory_space<vmem>>, vector<1x8x4xbf16>
    %23 = vector.shape_cast %22 : vector<1x8x4xbf16> to vector<8x4xbf16>
    %cst_30 = arith.constant dense<0.000000e+00> : vector<8x256xf32>
    %24 = tpu.matmul %23, %21, %cst_30 {dimension_numbers = #tpu.dot_dimension_numbers<[1], [0], [0], [1], [0, 0, 1, 1], [], []>} : vector<8x4xbf16>, vector<4x256xbf16>, vector<8x256xf32> -> vector<8x256xf32>
    %25 = arith.addf %20, %24 : vector<8x256xf32>
    %c0_31 = arith.constant 0 : index
    %c113 = arith.constant 113 : index
    %26 = vector.load %arg9[%c0_31, %c113] : memref<4x528xbf16, #tpu.memory_space<vmem>>, vector<4x256xbf16>
    %27 = vector.broadcast %14 : vector<1x256xbf16> to vector<4x256xbf16>
    %28 = arith.mulf %26, %27 : vector<4x256xbf16>
    %c2 = arith.constant 2 : index
    %c0_32 = arith.constant 0 : index
    %c0_33 = arith.constant 0 : index
    %29 = vector.load %arg5[%c2, %c0_32, %c0_33] : memref<9x8x4xbf16, #tpu.memory_space<vmem>>, vector<1x8x4xbf16>
    %30 = vector.shape_cast %29 : vector<1x8x4xbf16> to vector<8x4xbf16>
    %cst_34 = arith.constant dense<0.000000e+00> : vector<8x256xf32>
    %31 = tpu.matmul %30, %28, %cst_34 {dimension_numbers = #tpu.dot_dimension_numbers<[1], [0], [0], [1], [0, 0, 1, 1], [], []>} : vector<8x4xbf16>, vector<4x256xbf16>, vector<8x256xf32> -> vector<8x256xf32>
    %32 = arith.addf %25, %31 : vector<8x256xf32>
    %c0_35 = arith.constant 0 : index
    %c127 = arith.constant 127 : index
    %33 = vector.load %arg9[%c0_35, %c127] : memref<4x528xbf16, #tpu.memory_space<vmem>>, vector<4x256xbf16>
    %34 = vector.broadcast %13 : vector<1x256xbf16> to vector<4x256xbf16>
    %35 = arith.mulf %33, %34 : vector<4x256xbf16>
    %c3 = arith.constant 3 : index
    %c0_36 = arith.constant 0 : index
    %c0_37 = arith.constant 0 : index
    %36 = vector.load %arg5[%c3, %c0_36, %c0_37] : memref<9x8x4xbf16, #tpu.memory_space<vmem>>, vector<1x8x4xbf16>
    %37 = vector.shape_cast %36 : vector<1x8x4xbf16> to vector<8x4xbf16>
    %cst_38 = arith.constant dense<0.000000e+00> : vector<8x256xf32>
    %38 = tpu.matmul %37, %35, %cst_38 {dimension_numbers = #tpu.dot_dimension_numbers<[1], [0], [0], [1], [0, 0, 1, 1], [], []>} : vector<8x4xbf16>, vector<4x256xbf16>, vector<8x256xf32> -> vector<8x256xf32>
    %39 = arith.addf %32, %38 : vector<8x256xf32>
    %c0_39 = arith.constant 0 : index
    %c128_40 = arith.constant 128 : index
    %40 = vector.load %arg9[%c0_39, %c128_40] : memref<4x528xbf16, #tpu.memory_space<vmem>>, vector<4x256xbf16>
    %c4 = arith.constant 4 : index
    %c0_41 = arith.constant 0 : index
    %c0_42 = arith.constant 0 : index
    %41 = vector.load %arg5[%c4, %c0_41, %c0_42] : memref<9x8x4xbf16, #tpu.memory_space<vmem>>, vector<1x8x4xbf16>
    %42 = vector.shape_cast %41 : vector<1x8x4xbf16> to vector<8x4xbf16>
    %cst_43 = arith.constant dense<0.000000e+00> : vector<8x256xf32>
    %43 = tpu.matmul %42, %40, %cst_43 {dimension_numbers = #tpu.dot_dimension_numbers<[1], [0], [0], [1], [0, 0, 1, 1], [], []>} : vector<8x4xbf16>, vector<4x256xbf16>, vector<8x256xf32> -> vector<8x256xf32>
    %44 = arith.addf %39, %43 : vector<8x256xf32>
    %c0_44 = arith.constant 0 : index
    %c129 = arith.constant 129 : index
    %45 = vector.load %arg9[%c0_44, %c129] : memref<4x528xbf16, #tpu.memory_space<vmem>>, vector<4x256xbf16>
    %46 = vector.broadcast %14 : vector<1x256xbf16> to vector<4x256xbf16>
    %47 = arith.mulf %45, %46 : vector<4x256xbf16>
    %c5 = arith.constant 5 : index
    %c0_45 = arith.constant 0 : index
    %c0_46 = arith.constant 0 : index
    %48 = vector.load %arg5[%c5, %c0_45, %c0_46] : memref<9x8x4xbf16, #tpu.memory_space<vmem>>, vector<1x8x4xbf16>
    %49 = vector.shape_cast %48 : vector<1x8x4xbf16> to vector<8x4xbf16>
    %cst_47 = arith.constant dense<0.000000e+00> : vector<8x256xf32>
    %50 = tpu.matmul %49, %47, %cst_47 {dimension_numbers = #tpu.dot_dimension_numbers<[1], [0], [0], [1], [0, 0, 1, 1], [], []>} : vector<8x4xbf16>, vector<4x256xbf16>, vector<8x256xf32> -> vector<8x256xf32>
    %51 = arith.addf %44, %50 : vector<8x256xf32>
    %c0_48 = arith.constant 0 : index
    %c143 = arith.constant 143 : index
    %52 = vector.load %arg9[%c0_48, %c143] : memref<4x528xbf16, #tpu.memory_space<vmem>>, vector<4x256xbf16>
    %53 = vector.broadcast %13 : vector<1x256xbf16> to vector<4x256xbf16>
    %54 = arith.mulf %52, %53 : vector<4x256xbf16>
    %c6 = arith.constant 6 : index
    %c0_49 = arith.constant 0 : index
    %c0_50 = arith.constant 0 : index
    %55 = vector.load %arg5[%c6, %c0_49, %c0_50] : memref<9x8x4xbf16, #tpu.memory_space<vmem>>, vector<1x8x4xbf16>
    %56 = vector.shape_cast %55 : vector<1x8x4xbf16> to vector<8x4xbf16>
    %cst_51 = arith.constant dense<0.000000e+00> : vector<8x256xf32>
    %57 = tpu.matmul %56, %54, %cst_51 {dimension_numbers = #tpu.dot_dimension_numbers<[1], [0], [0], [1], [0, 0, 1, 1], [], []>} : vector<8x4xbf16>, vector<4x256xbf16>, vector<8x256xf32> -> vector<8x256xf32>
    %58 = arith.addf %51, %57 : vector<8x256xf32>
    %c0_52 = arith.constant 0 : index
    %c144 = arith.constant 144 : index
    %59 = vector.load %arg9[%c0_52, %c144] : memref<4x528xbf16, #tpu.memory_space<vmem>>, vector<4x256xbf16>
    %c7 = arith.constant 7 : index
    %c0_53 = arith.constant 0 : index
    %c0_54 = arith.constant 0 : index
    %60 = vector.load %arg5[%c7, %c0_53, %c0_54] : memref<9x8x4xbf16, #tpu.memory_space<vmem>>, vector<1x8x4xbf16>
    %61 = vector.shape_cast %60 : vector<1x8x4xbf16> to vector<8x4xbf16>
    %cst_55 = arith.constant dense<0.000000e+00> : vector<8x256xf32>
    %62 = tpu.matmul %61, %59, %cst_55 {dimension_numbers = #tpu.dot_dimension_numbers<[1], [0], [0], [1], [0, 0, 1, 1], [], []>} : vector<8x4xbf16>, vector<4x256xbf16>, vector<8x256xf32> -> vector<8x256xf32>
    %63 = arith.addf %58, %62 : vector<8x256xf32>
    %c0_56 = arith.constant 0 : index
    %c145 = arith.constant 145 : index
    %64 = vector.load %arg9[%c0_56, %c145] : memref<4x528xbf16, #tpu.memory_space<vmem>>, vector<4x256xbf16>
    %65 = vector.broadcast %14 : vector<1x256xbf16> to vector<4x256xbf16>
    %66 = arith.mulf %64, %65 : vector<4x256xbf16>
    %c8 = arith.constant 8 : index
    %c0_57 = arith.constant 0 : index
    %c0_58 = arith.constant 0 : index
    %67 = vector.load %arg5[%c8, %c0_57, %c0_58] : memref<9x8x4xbf16, #tpu.memory_space<vmem>>, vector<1x8x4xbf16>
    %68 = vector.shape_cast %67 : vector<1x8x4xbf16> to vector<8x4xbf16>
    %cst_59 = arith.constant dense<0.000000e+00> : vector<8x256xf32>
    %69 = tpu.matmul %68, %66, %cst_59 {dimension_numbers = #tpu.dot_dimension_numbers<[1], [0], [0], [1], [0, 0, 1, 1], [], []>} : vector<8x4xbf16>, vector<4x256xbf16>, vector<8x256xf32> -> vector<8x256xf32>
    %70 = arith.addf %63, %69 : vector<8x256xf32>
    %c0_60 = arith.constant 0 : index
    %c0_61 = arith.constant 0 : index
    %71 = vector.load %arg7[%c0_60, %c0_61] : memref<8x1xf32, #tpu.memory_space<vmem>>, vector<8x1xf32>
    %72 = vector.broadcast %71 : vector<8x1xf32> to vector<8x256xf32>
    %73 = arith.addf %70, %72 : vector<8x256xf32>
    %cst_62 = arith.constant 0.000000e+00 : f32
    %74 = vector.broadcast %cst_62 : f32 to vector<8x256xf32>
    %75 = arith.cmpf oge, %73, %74 : vector<8x256xf32>
    %cst_63 = arith.constant 1.000000e-01 : f32
    %76 = vector.broadcast %cst_63 : f32 to vector<8x256xf32>
    %77 = arith.mulf %76, %73 : vector<8x256xf32>
    %78 = arith.select %75, %73, %77 : vector<8x256xi1>, vector<8x256xf32>
    %c0_64 = arith.constant 0 : index
    %c0_65 = arith.constant 0 : index
    %c0_66 = arith.constant 0 : index
    %79 = vector.load %arg8[%c0_64, %c0_65, %c0_66] : memref<1x8x256xf32, #tpu.memory_space<vmem>>, vector<1x8x256xf32>
    %80 = vector.shape_cast %79 : vector<1x8x256xf32> to vector<8x256xf32>
    %81 = vector.shape_cast %78 : vector<8x256xf32> to vector<1x8x256xf32>
    tpu.vector_store %arg8[%c0_64, %c0_65, %c0_66], %81 {strides = array<i32>} : memref<1x8x256xf32, #tpu.memory_space<vmem>>, vector<1x8x256xf32>,
    return
  }
  func.func @transform_0(%arg0: i32, %arg1: i32) -> (i32, i32, i32) {
    %c0_i32 = arith.constant 0 : i32
    %c0_i32_0 = arith.constant 0 : i32
    return %arg0, %c0_i32, %arg1 : i32, i32, i32
  }
  func.func @transform_1(%arg0: i32, %arg1: i32) -> (i32, i32, i32, i32) {
    %c0_i32 = arith.constant 0 : i32
    %c0_i32_0 = arith.constant 0 : i32
    %c0_i32_1 = arith.constant 0 : i32
    return %arg0, %arg1, %c0_i32, %c0_i32_0 : i32, i32, i32, i32
  }
  func.func @transform_2(%arg0: i32, %arg1: i32) -> (i32, i32, i32, i32) {
    %c0_i32 = arith.constant 0 : i32
    %c0_i32_0 = arith.constant 0 : i32
    %c0_i32_1 = arith.constant 0 : i32
    return %arg0, %arg1, %c0_i32, %c0_i32_0 : i32, i32, i32, i32
  }
  func.func @transform_3(%arg0: i32, %arg1: i32) -> (i32, i32, i32) {
    %c0_i32 = arith.constant 0 : i32
    %c0_i32_0 = arith.constant 0 : i32
    %c0_i32_1 = arith.constant 0 : i32
    %c0_i32_2 = arith.constant 0 : i32
    return %c0_i32, %c0_i32_0, %c0_i32_1 : i32, i32, i32
  }
  func.func @transform_4(%arg0: i32, %arg1: i32) -> (i32, i32) {
    %c0_i32 = arith.constant 0 : i32
    %c0_i32_0 = arith.constant 0 : i32
    %c0_i32_1 = arith.constant 0 : i32
    return %c0_i32, %c0_i32_0 : i32, i32
  }
  func.func @transform_5(%arg0: i32, %arg1: i32) -> (i32, i32) {
    %c0_i32 = arith.constant 0 : i32
    %c0_i32_0 = arith.constant 0 : i32
    %c0_i32_1 = arith.constant 0 : i32
    return %c0_i32, %c0_i32_0 : i32, i32
  }
  func.func @transform_6(%arg0: i32, %arg1: i32) -> (i32, i32, i32) {
    %c0_i32 = arith.constant 0 : i32
    %c0_i32_0 = arith.constant 0 : i32
    return %arg0, %c0_i32, %arg1 : i32, i32, i32
  }
}

</mosaic_0001>

<bundles_post_ra>
// kernel: tran_conv_relu.1
= control target key start
LH: loop header
LB: loop body
LE: loop exit
PB: predicated region body
PF: predicated region fallthrough
CT: control target
= control target key end

     0   :  { %s1467_s21 = smov 0   ;;  %s1469_s22 = smov 0   ;;  %s1650_s0 = inlined_call_operand.vmem [shape: bf16[2,4,256], index: 0, kind: input, shape index: {}]   ;;  %s1651_s1 = inlined_call_operand.vmem [shape: bf16[2,1,4,16], index: 1, kind: input, shape index: {}, may-alias: {1,2}]   ;;  %s1652_s2 = inlined_call_operand.vmem [shape: bf16[2,1,4,16], index: 2, kind: input, shape index: {}, may-alias: {1,2}]   ;;  %s1653_s3 = inlined_call_operand.vmem [shape: bf16[9,8,4], index: 3, kind: input, shape index: {}]   ;;  %s1654_s4 = inlined_call_operand.vmem [shape: bf16[2,256], index: 4, kind: input, shape index: {}]   ;;  %s1655_s5 = inlined_call_operand.vmem [shape: f32[8,1], index: 5, kind: input, shape index: {}]   ;;  %s1656_s6 = inlined_call_operand.vmem [shape: f32[2,8,256], index: 6, kind: output, shape index: {}]  }
   0x1   :  { %s1471_s23 = smov 0  }
   0x2 LB: > { %s28_s24 = sadd.s32 1, %s1415_s22  ;;  %p1319_p0 = scmp.ge.s32.totalorder %s1419_s23, 1  ;;  %s1419_s23 = sphi %s1471_s23, %s16_s23   ;;  %s1415_s22 = sphi %s1469_s22, %s1658_s22   ;;  %s1411_s21 = sphi %s1467_s21, %s1657_s21  }
   0x3   : > { %p30_p1 = scmp.ge.s32.totalorder %s28_s24, 2  ;;  %p261_p2 = scmp.lt.s32.totalorder %s1419_s23, 3 }
   0x5   : > { %s1660_s24 = smov (%p30_p1, %s28_s24), 0  ;;  %p262_p3 = pnand %p1319_p0, %p261_p2 }
   0x6   : > { %p314_p4 = scmp.lt.s32.totalorder (!%p262_p3), %s1411_s21, 1  ;;  %s1424_s14 = smov (!%p262_p3), 112  }
   0x7   : > { %265 = sbr.rel (%p262_p3) target bundleno = 517 (0x205), region = 44  ;;  %s1425_s15 = smov (!%p262_p3), 111  }
   0x8   : > { %s1426_s16 = smov (!%p262_p3), 113   ;;  %s1427_s17 = smov (!%p262_p3), 1  }
   0x9   : > { %s1428_s18 = smov (!%p262_p3), 127   ;;  %s1429_s19 = smov (!%p262_p3), 17  }
   0xa   : > { %s1430_s20 = smov (!%p262_p3), 15   ;;  %s1431_s25 = smov (!%p262_p3), 16  }
   0xc   : > { %vm350_vm0 = vcmask 1041536   ;;  %vm351_vm1 = vcmask 125954   ;;  %v1326_v0 = vld.sshfl [vmem:[%s1654_s4] sm:$0x11 pattern:$0x75316420]  ;;  %v380_v1 = vlaneseq }
   0xd   : > { %vm352_vm2 = vmor %vm351_vm1, %vm350_vm0  ;;  %v1421_v2 = vmov 0   ;;  %s1662_s21 = smov (!%p314_p4, %s1411_s21), 1  ;;  %v1422_v3 = vmov 1966171168   ;;  %vm348_vm3 = vcmask 910336   ;;  %vm364_vm4 = vcmask 123904  }
   0xe   : > { %494 = vmatprep.mubr.bf16.mxu0 %v1421_v2  ;;  %570 = vmatprep.mubr.bf16.mxu1 %v1421_v2  ;;  %353 = vst.msk [vmem:[#allocation2 + $0x6] sm:$0xf] %vm352_vm2, %v1421_v2  ;;  %v378_v4 = vunpack.c.l.s4 %v1422_v3  ;;  %v381_v5 = vshrl.u32 %v380_v1, 7  ;;  %v1423_v6 = vmov 1983009808   ;;  %s1322_s27 = sshll.u32 %s1662_s21, 1  ;;  %v376_v8 = vcombine.high %v1326_v0, %v1326_v0 }
   0xf   : > { %1393 = vset.pattern.permute.xlu1 %v1421_v2  ;;  %1394 = vset.pattern.permute.xlu0 %v1421_v2  ;;  %v409_v7 = vunpack.c.l.s4 %v1423_v6  ;;  %349 = vst.msk [vmem:[#allocation2] sm:$0x3] %vm348_vm3, %v1421_v2  ;;  %s1356_s28 = sshll.u32 %s1662_s21, 2  ;;  %s329_s7 = scalar_lea.vmem %s1651_s1, %s1322_s27  ;;  %vm359_vm5 = vcmask 1042304   ;;  %vm418_vm6 = vcmask 908288   ;;  %vm607_vm7 = vcmask 924672  }
  0x10   : > { %v379_v9 = vunpack.c.0.s8 %v378_v4  ;;  %s336_s10 = scalar_lea.vmem %s1652_s2, %s1322_s27  ;;  %v354_v10 = vld [vmem:[%s329_s7] sm:$0x3]  ;;  %s321_s13 = scalar_lea.vmem %s1650_s0, %s1356_s28  ;;  %v396_v17 = vsub.s32 0, %v381_v5  ;;  %vm695_vm8 = vcmask 1039360   ;;  %vm724_vm9 = vcmask 7168  }
  0x11   : > { %v363_v11 = vld [vmem:[%s336_s10] sm:$0x3]  ;;  %356 = vrot.lane.b32.xlu0 %v354_v10, %s1424_s14  ;;  %v410_v14 = vunpack.c.0.s8 %v409_v7  ;;  %vm636_vm10 = vcmask 121856   ;;  %vm526_vm11 = vcmask 138240   ;;  %vm448_vm12 = vcmask 130048   ;;  %s1357_s26 = sshll.u32 %s1662_s21, 4 }
  0x12   : > { %v382_v12 = vsub.s32 %v379_v9, %v381_v5  ;;  %365 = vst.msk [vmem:[#allocation2 + $0x6] sm:$0x3] %vm364_vm4, %v363_v11  ;;  %v361_v13 = vld [vmem:[%s321_s13] sm:$0xf]  ;;  %vm455_vm13 = vcmask 1041408   ;;  %vm451_vm14 = vcmask 31744   ;;  %s345_s29 = scalar_lea.vmem %s1656_s6, %s1357_s26 }
  0x13   : > { %362 = vst [vmem:[#allocation2 + $0x2] sm:$0xf] %v361_v13  ;;  %v1508_v22 = vsub.s32 %v410_v14, %v381_v5  ;;  %vm1041_vm15 = vcmask 916480  }
  0x14   : > { %v383_v15 = vrot.slane %v1326_v0, %v382_v12  ;;  %v390_v16 = vrot.slane %v376_v8, %v382_v12 }
  0x16   : > { %v392_v18 = vpack.i.b16 %v383_v15, %v383_v15  ;;  %v399_v19 = vpack.i.b16 %v390_v16, %v390_v16  ;;  %v580_v20 = vshrl.u32 %v383_v15, 16  ;;  %v587_v21 = vshrl.u32 %v390_v16, 16 }
  0x18   : > { %v397_v23 = vrot.slane %v392_v18, %v396_v17  ;;  %v404_v24 = vrot.slane %v399_v19, %v396_v17  ;;  %v581_v25 = vpack.i.b16 %v580_v20, %v580_v20  ;;  %v588_v26 = vpack.i.b16 %v587_v21, %v587_v21 }
  0x1a   : > { %v407_v27 = vcombine.low %v397_v23, %v404_v24  ;;  %v586_v28 = vrot.slane %v581_v25, %v396_v17  ;;  %v593_v29 = vrot.slane %v588_v26, %v396_v17  ;;  %v843_v62 = vld [vmem:[#allocation2 + $0x2] sm:$0x3f] }
  0x1b   : > { %v929_v0 = vld [vmem:[#allocation2 + $0x2] sm:$0x3f] }
  0x1c   : > { %v414_v30 = vrot.slane %v407_v27, %v1508_v22  ;;  %v596_v31 = vcombine.low %v586_v28, %v593_v29  ;;  %v1096_v19 = vld [vmem:[#allocation2 + $0x2] sm:$0x3f] }
  0x1d   : > { %v1015_v21 = vld [vmem:[#allocation2 + $0x2] sm:$0x3f] }
  0x1e   : > { %415 = vrot.lane.b32.xlu0 %v414_v30, %s1425_s15  ;;  %v603_v32 = vrot.slane %v596_v31, %v1508_v22  ;;  %v1026_v26 = vrot.slane %v1015_v21, %v1508_v22  ;;  %v1019_v27 = vcombine.high %v1015_v21, %v1015_v21 }
  0x20   : > { %604 = vrot.lane.b32.xlu1 %v603_v32, %s1426_s16  ;;  %v1034_v31 = vcombine.high %v1026_v26, %v1026_v26 }
  0x22   : > { %844 = vrot.lane.b32.xlu0 %v603_v32, %s1427_s17 }
  0x24   : > { %692 = vrot.lane.b32.xlu1 %v414_v30, %s1428_s18 }
  0x26   : > { %1097 = vrot.lane.b32.xlu0 %v603_v32, %s1429_s19 }
  0x28   : > { %930 = vrot.lane.b32.xlu1 %v414_v30, %s1430_s20  ;;  %v1033_v30 = vrot.slane %v1019_v27, %v1508_v22 }
  0x83   : > { %v357_v33 = vpop.permute.xlu0 %356 }
  0x84   : > { %360 = vst.msk [vmem:[#allocation2] sm:$0x3] %vm359_vm5, %v357_v33 }
  0x8b   : > { %v367_v34 = vld [vmem:[#allocation2] sm:$0x3f] }
  0x8c   : > { %v433_v35 = vrot.slane %v367_v34, %v1508_v22  ;;  %v426_v36 = vcombine.high %v367_v34, %v367_v34  ;;  %v579_v48 = vld [vmem:[#allocation2] sm:$0x3f] }
  0x8d   : > { %v691_v53 = vld [vmem:[#allocation2] sm:$0x3f] }
  0x8e   : > { %442 = vrot.lane.b32.xlu1 %v433_v35, %s1431_s25  ;;  %v441_v38 = vcombine.high %v433_v35, %v433_v35  ;;  %v440_v39 = vrot.slane %v426_v36, %v1508_v22 }
  0x90   : > { %v416_v37 = vpop.permute.xlu0 %415  ;;  %444 = vrot.lane.b32.xlu0 %v441_v38, %s1431_s25 }
  0x91   : > { %v417_v40 = vrot.slane %v416_v37, 6 }
  0x92   : > { %v605_v41 = vpop.permute.xlu1 %604  ;;  %446 = vrot.lane.b32.xlu1 %v440_v39, %s1431_s25 }
  0x93   : > { %v419_v42 = vsel %vm418_vm6, %v417_v40, %v416_v37  ;;  %v606_v43 = vrot.slane %v605_v41, 6 }
  0x94   : > { %v421_v44 = vmul.bf16 %v419_v42, %v367_v34  ;;  %v845_v52 = vpop.permute.xlu0 %844  ;;  %v1182_v34 = vld [vmem:[%s1655_s5] sm:$0xff] }
  0x95   : > { %v608_v45 = vsel %vm607_vm7, %v606_v43, %v605_v41  ;;  %v846_v57 = vrot.slane %v845_v52, 6  ;;  %v1327_v42 = vld [vmem:[%s1653_s3 + $0x4] sm:$0xf] }
  0x96   : > { %v693_v46 = vpop.permute.xlu1 %692  ;;  %v511_v47 = vrot.slane %v421_v44, %v1508_v22  ;;  %v610_v50 = vmul.bf16 %v608_v45, %v579_v48  ;;  %v504_v59 = vcombine.high %v421_v44, %v421_v44 }
  0x97   : > { %v694_v49 = vrot.slane %v693_v46, 6  ;;  %v847_v63 = vsel %vm724_vm9, %v846_v57, %v845_v52  ;;  %v422_v52 = vld [vmem:[%s1653_s3] sm:$0xf] }
  0x98   : > { %520 = vrot.lane.b32.xlu0 %v511_v47, %s1429_s19  ;;  %v519_v51 = vcombine.high %v511_v47, %v511_v47  ;;  %v621_v61 = vrot.slane %v610_v50, %v1508_v22  ;;  %v614_v3 = vcombine.high %v610_v50, %v610_v50  ;;  %v518_v6 = vrot.slane %v504_v59, %v1508_v22  ;;  %v1098_v14 = vpop.permute.xlu0 %1097 }
  0x99   : > { %v696_v54 = vsel %vm695_vm8, %v694_v49, %v693_v46  ;;  %v849_v7 = vmul.bf16 %v847_v63, %v843_v62  ;;  %v1099_v16 = vrot.slane %v1098_v14, 6 }
  0x9a   : > { %v698_v55 = vmul.bf16 %v696_v54, %v691_v53  ;;  %522 = vrot.lane.b32.xlu1 %v519_v51, %s1429_s19  ;;  %v931_v56 = vpop.permute.xlu1 %930  ;;  %v628_v9 = vrot.slane %v614_v3, %v1508_v22  ;;  %v629_v13 = vcombine.high %v621_v61, %v621_v61 }
  0x9b   : > { %v932_v58 = vrot.slane %v931_v56, 6  ;;  %v860_v12 = vrot.slane %v849_v7, %v1508_v22  ;;  %v853_v17 = vcombine.high %v849_v7, %v849_v7  ;;  %v1100_v20 = vsel %vm526_vm11, %v1099_v16, %v1098_v14 }
  0x9c   : > { %v709_v60 = vrot.slane %v698_v55, %v1508_v22  ;;  %v702_v4 = vcombine.high %v698_v55, %v698_v55  ;;  %v1102_v25 = vmul.bf16 %v1100_v20, %v1096_v19 }
  0x9d   : > { %v933_v1 = vsel %vm636_vm10, %v932_v58, %v931_v56  ;;  %v867_v23 = vrot.slane %v853_v17, %v1508_v22  ;;  %v868_v28 = vcombine.high %v860_v12, %v860_v12  ;;  %v1339_v56 = vld.sshfl [vmem:[#allocation2 + $0x2] sm:$0x33 pattern:$0x76325410]  ;;  %v1342_v17 = vld [vmem:[%s1653_s3 + $0x14] sm:$0xf] }
  0x9e   : > { %718 = vrot.lane.b32.xlu0 %v709_v60, %s1427_s17  ;;  %630 = vrot.lane.b32.xlu1 %v621_v61, %s1430_s20  ;;  %v717_v5 = vcombine.high %v709_v60, %v709_v60  ;;  %v935_v8 = vmul.bf16 %v933_v1, %v929_v0  ;;  %v716_v10 = vrot.slane %v702_v4, %v1508_v22  ;;  %v1332_v0 = vld [vmem:[%s1653_s3 + $0x8] sm:$0xf]  ;;  %v1335_v1 = vld [vmem:[%s1653_s3 + $0xc] sm:$0xf] }
  0x9f   : > { %v1113_v29 = vrot.slane %v1102_v25, %v1508_v22  ;;  %v1106_v33 = vcombine.high %v1102_v25, %v1102_v25  ;;  %v790_v60 = vcombine.high %v1339_v56, %v1339_v56 }
  0xa0   : > { %v946_v11 = vrot.slane %v935_v8, %v1508_v22  ;;  %v939_v18 = vcombine.high %v935_v8, %v935_v8 }
  0xa1   : > { %v1121_v32 = vcombine.high %v1113_v29, %v1113_v29  ;;  %v1120_v35 = vrot.slane %v1106_v33, %v1508_v22 }
  0xa2   : > { %720 = vrot.lane.b32.xlu1 %v717_v5, %s1427_s17  ;;  %524 = vrot.lane.b32.xlu0 %v518_v6, %s1429_s19  ;;  %v954_v15 = vcombine.high %v946_v11, %v946_v11  ;;  %v953_v24 = vrot.slane %v939_v18, %v1508_v22  ;;  %v795_v5 = vsel %vm455_vm13, %v1339_v56, 0 }
  0xa6   : > { %634 = vrot.lane.b32.xlu1 %v628_v9, %s1430_s20  ;;  %722 = vrot.lane.b32.xlu0 %v716_v10, %s1427_s17  ;;  %v1338_v10 = vld [vmem:[%s1653_s3 + $0x10] sm:$0xf] }
  0xaa   : > { %869 = vrot.lane.b32.xlu1 %v860_v12, %s1428_s18  ;;  %632 = vrot.lane.b32.xlu0 %v629_v13, %s1430_s20 }
  0xae   : > { %957 = vrot.lane.b32.xlu1 %v954_v15, %s1426_s16  ;;  %955 = vrot.lane.b32.xlu0 %v946_v11, %s1426_s16 }
  0xb2   : > { %873 = vrot.lane.b32.xlu1 %v867_v23, %s1428_s18  ;;  %959 = vrot.lane.b32.xlu0 %v953_v24, %s1426_s16  ;;  %v1345_v24 = vld [vmem:[%s1653_s3 + $0x18] sm:$0xf] }
  0xb6   : > { %1035 = vrot.lane.b32.xlu1 %v1026_v26, %s1424_s14  ;;  %871 = vrot.lane.b32.xlu0 %v868_v28, %s1428_s18  ;;  %v1348_v28 = vld [vmem:[%s1653_s3 + $0x1c] sm:$0xf] }
  0xba   : > { %1039 = vrot.lane.b32.xlu1 %v1033_v30, %s1424_s14  ;;  %1037 = vrot.lane.b32.xlu0 %v1034_v31, %s1424_s14 }
  0xbe   : > { %1124 = vrot.lane.b32.xlu1 %v1121_v32, %s1425_s15  ;;  %1122 = vrot.lane.b32.xlu0 %v1113_v29, %s1425_s15  ;;  %v1351_v32 = vld [vmem:[%s1653_s3 + $0x20] sm:$0xf] }
  0xc2   : > { %1126 = vrot.lane.b32.xlu0 %v1120_v35, %s1425_s15  ;;  %1185 = vperm.xlu1 %1393, %v1182_v34  }
 0x100   : > { %v443_v36 = vpop.permute.xlu1 %442 }
 0x102   : > { %v445_v37 = vpop.permute.xlu0 %444 }
 0x103   : > { %v449_v38 = vsel %vm448_vm12, %v443_v36, %v445_v37 }
 0x104   : > { %v447_v39 = vpop.permute.xlu1 %446  ;;  %v457_v40 = vsel %vm455_vm13, %v449_v38, 0 }
 0x105   : > { %v450_v41 = vsel %vm448_vm12, %v445_v37, %v447_v39 }
 0x106   : > { %1328 = vmatprep.subr.msk.bf16.mxu0 %vm455_vm13, %v450_v41 }
 0x107   : > { %477 = vmatpush1.bf16.msra.mxu0 %v457_v40 }
 0x10a   : > { %v521_v22 = vpop.permute.xlu0 %520  ;;  %1329 = vmatmul.mubr.msk.bf16.vlgmr.msra.gmra.mxu0 %vm451_vm14, %v1327_v42 }
 0x10b   : > { %680 = vmatprep.mubr.bf16.mxu0 %v1421_v2 }
 0x10c   : > { %v523_v43 = vpop.permute.xlu1 %522 }
 0x10d   : > { %v527_v46 = vsel %vm526_vm11, %v521_v22, %v523_v43 }
 0x10e   : > { %v533_v50 = vsel %vm455_vm13, %v527_v46, 0 }
 0x110   : > { %v719_v44 = vpop.permute.xlu0 %718  ;;  %v631_v45 = vpop.permute.xlu1 %630 }
 0x114   : > { %v721_v47 = vpop.permute.xlu1 %720  ;;  %v525_v48 = vpop.permute.xlu0 %524 }
 0x115   : > { %v528_v49 = vsel %vm526_vm11, %v523_v43, %v525_v48  ;;  %v725_v51 = vsel %vm724_vm9, %v719_v44, %v721_v47 }
 0x116   : > { %1330 = vmatprep.subr.msk.bf16.mxu1 %vm455_vm13, %v528_v49  ;;  %v731_v57 = vsel %vm455_vm13, %v725_v51, 0 }
 0x117   : > { %553 = vmatpush1.bf16.msra.mxu1 %v533_v50 }
 0x118   : > { %v635_v53 = vpop.permute.xlu1 %634  ;;  %v723_v54 = vpop.permute.xlu0 %722 }
 0x119   : > { %v726_v55 = vsel %vm724_vm9, %v721_v47, %v723_v54 }
 0x11a   : > { %1336 = vmatprep.subr.msk.bf16.mxu1 %vm455_vm13, %v726_v55  ;;  %1331 = vmatmul.mubr.msk.bf16.vlgmr.msra.gmra.mxu1 %vm451_vm14, %v422_v52 }
 0x11b   : > { %751 = vmatpush1.bf16.msra.mxu1 %v731_v57  ;;  %768 = vmatprep.mubr.bf16.mxu1 %v1421_v2 }
 0x11c   : > { %v870_v58 = vpop.permute.xlu1 %869  ;;  %v633_v59 = vpop.permute.xlu0 %632 }
 0x11d   : > { %v637_v61 = vsel %vm636_vm10, %v631_v45, %v633_v59  ;;  %v638_v62 = vsel %vm636_vm10, %v633_v59, %v635_v53 }
 0x11e   : > { %v643_v63 = vsel %vm455_vm13, %v637_v61, 0  ;;  %1333 = vmatprep.subr.msk.bf16.mxu0 %vm455_vm13, %v638_v62 }
 0x11f   : > { %663 = vmatpush1.bf16.msra.mxu0 %v643_v63 }
 0x120   : > { %v958_v3 = vpop.permute.xlu1 %957  ;;  %v956_v4 = vpop.permute.xlu0 %955  ;;  %1340 = vmatprep.subr.msk.bf16.mxu0 %vm455_vm13, %v790_v60 }
 0x121   : > { %v961_v9 = vsel %vm607_vm7, %v956_v4, %v958_v3 }
 0x122   : > { %1334 = vmatmul.mubr.msk.bf16.vlgmr.msra.gmra.mxu0 %vm451_vm14, %v1332_v0  ;;  %1337 = vmatmul.mubr.msk.bf16.vlgmr.msra.gmra.mxu1 %vm451_vm14, %v1335_v1  ;;  %v967_v15 = vsel %vm455_vm13, %v961_v9, 0 }
 0x123   : > { %815 = vmatpush1.bf16.msra.mxu0 %v795_v5  ;;  %832 = vmatprep.mubr.bf16.mxu0 %v1421_v2 }
 0x124   : > { %v874_v6 = vpop.permute.xlu1 %873  ;;  %v960_v7 = vpop.permute.xlu0 %959  ;;  %918 = vmatprep.mubr.bf16.mxu1 %v1421_v2 }
 0x125   : > { %v962_v8 = vsel %vm607_vm7, %v958_v3, %v960_v7 }
 0x126   : > { %1346 = vmatprep.subr.msk.bf16.mxu0 %vm455_vm13, %v962_v8 }
 0x128   : > { %v1036_v11 = vpop.permute.xlu1 %1035  ;;  %v872_v12 = vpop.permute.xlu0 %871 }
 0x129   : > { %v875_v13 = vsel %vm695_vm8, %v870_v58, %v872_v12  ;;  %v876_v14 = vsel %vm695_vm8, %v872_v12, %v874_v6 }
 0x12a   : > { %v881_v16 = vsel %vm455_vm13, %v875_v13, 0  ;;  %1341 = vmatmul.mubr.msk.bf16.vlgmr.msra.gmra.mxu0 %vm451_vm14, %v1338_v10  ;;  %1343 = vmatprep.subr.msk.bf16.mxu1 %vm455_vm13, %v876_v14 }
 0x12b   : > { %987 = vmatpush1.bf16.msra.mxu0 %v967_v15  ;;  %901 = vmatpush1.bf16.msra.mxu1 %v881_v16 }
 0x12c   : > { %v1040_v18 = vpop.permute.xlu1 %1039  ;;  %v1038_v19 = vpop.permute.xlu0 %1037  ;;  %1004 = vmatprep.mubr.bf16.mxu0 %v1421_v2 }
 0x12d   : > { %v1042_v20 = vsel %vm1041_vm15, %v1036_v11, %v1038_v19  ;;  %v1043_v21 = vsel %vm1041_vm15, %v1038_v19, %v1040_v18 }
 0x12e   : > { %v1048_v23 = vsel %vm455_vm13, %v1042_v20, 0  ;;  %1344 = vmatmul.mubr.msk.bf16.vlgmr.msra.gmra.mxu1 %vm451_vm14, %v1342_v17  ;;  %1349 = vmatprep.subr.msk.bf16.mxu1 %vm455_vm13, %v1043_v21 }
 0x12f   : > { %1068 = vmatpush1.bf16.msra.mxu1 %v1048_v23  ;;  %1085 = vmatprep.mubr.bf16.mxu1 %v1421_v2 }
 0x130   : > { %v1125_v25 = vpop.permute.xlu1 %1124  ;;  %v1123_v26 = vpop.permute.xlu0 %1122 }
 0x131   : > { %v1128_v27 = vsel %vm418_vm6, %v1123_v26, %v1125_v25 }
 0x132   : > { %1347 = vmatmul.mubr.msk.bf16.vlgmr.msra.gmra.mxu0 %vm451_vm14, %v1345_v24  ;;  %v1134_v31 = vsel %vm455_vm13, %v1128_v27, 0 }
 0x133   : > { %1171 = vmatprep.mubr.bf16.mxu0 %v1421_v2 }
 0x134   : > { %v1127_v29 = vpop.permute.xlu0 %1126 }
 0x135   : > { %v1129_v30 = vsel %vm418_vm6, %v1125_v25, %v1127_v29 }
 0x136   : > { %1350 = vmatmul.mubr.msk.bf16.vlgmr.msra.gmra.mxu1 %vm451_vm14, %v1348_v28  ;;  %1352 = vmatprep.subr.msk.bf16.mxu0 %vm455_vm13, %v1129_v30 }
 0x137   : > { %1154 = vmatpush1.bf16.msra.mxu0 %v1134_v31 }
 0x13a   : > { %1353 = vmatmul.mubr.msk.bf16.vlgmr.msra.gmra.mxu0 %vm451_vm14, %v1351_v32 }
 0x13d   : > { %v1186_v11 = vpop.permute.xlu1 %1185 }
 0x1ca   : > { %v496_v33 = vpop.f32.mrf.mxu0 }
 0x1cc   : > { %v498_v34 = vpop.f32.mrf.mxu0 }
 0x1ce   : > { %v500_v35 = vpop.f32.mrf.mxu0 }
 0x1d0   : > { %v501_v2 = vpop.f32.mrf.mxu0 }
 0x1da   : > { %v572_v36 = vpop.f32.mrf.mxu1 }
 0x1db   : > { %v573_v48 = vadd.f32 %v572_v36, %v496_v33 }
 0x1dc   : > { %v574_v37 = vpop.f32.mrf.mxu1 }
 0x1dd   : > { %v575_v50 = vadd.f32 %v574_v37, %v498_v34 }
 0x1de   : > { %v576_v38 = vpop.f32.mrf.mxu1 }
 0x1e0   : > { %v577_v39 = vpop.f32.mrf.mxu1 }
 0x1e2   : > { %v682_v40 = vpop.f32.mrf.mxu0  ;;  %v770_v41 = vpop.f32.mrf.mxu1 }
 0x1e3   : > { %v689_v51 = vadd.f32 %v682_v40, %v573_v48 }
 0x1e4   : > { %v684_v42 = vpop.f32.mrf.mxu0  ;;  %v772_v22 = vpop.f32.mrf.mxu1 }
 0x1e5   : > { %v690_v54 = vadd.f32 %v684_v42, %v575_v50  ;;  %v777_v57 = vadd.f32 %v770_v41, %v689_v51 }
 0x1e6   : > { %v686_v43 = vpop.f32.mrf.mxu0  ;;  %v774_v44 = vpop.f32.mrf.mxu1 }
 0x1e7   : > { %v778_v60 = vadd.f32 %v772_v22, %v690_v54 }
 0x1e8   : > { %v687_v45 = vpop.f32.mrf.mxu0  ;;  %v775_v46 = vpop.f32.mrf.mxu1 }
 0x1ea   : > { %v834_v47 = vpop.f32.mrf.mxu0 }
 0x1eb   : > { %v841_v61 = vadd.f32 %v834_v47, %v777_v57 }
 0x1ec   : > { %v836_v49 = vpop.f32.mrf.mxu0 }
 0x1ed   : > { %v842_v0 = vadd.f32 %v836_v49, %v778_v60 }
 0x1ee   : > { %v838_v52 = vpop.f32.mrf.mxu0  ;;  %v920_v53 = vpop.f32.mrf.mxu1 }
 0x1ef   : > { %v927_v1 = vadd.f32 %v920_v53, %v841_v61 }
 0x1f0   : > { %v839_v55 = vpop.f32.mrf.mxu0  ;;  %v922_v56 = vpop.f32.mrf.mxu1 }
 0x1f1   : > { %v928_v5 = vadd.f32 %v922_v56, %v842_v0 }
 0x1f2   : > { %v924_v58 = vpop.f32.mrf.mxu1  ;;  %v1006_v59 = vpop.f32.mrf.mxu0 }
 0x1f3   : > { %v1013_v6 = vadd.f32 %v1006_v59, %v927_v1 }
 0x1f4   : > { %v925_v62 = vpop.f32.mrf.mxu1  ;;  %v1008_v63 = vpop.f32.mrf.mxu0 }
 0x1f5   : > { %v1014_v9 = vadd.f32 %v1008_v63, %v928_v5 }
 0x1f6   : > { %v1010_v3 = vpop.f32.mrf.mxu0  ;;  %v1087_v4 = vpop.f32.mrf.mxu1 }
 0x1f7   : > { %v1094_v10 = vadd.f32 %v1087_v4, %v1013_v6 }
 0x1f8   : > { %v1011_v7 = vpop.f32.mrf.mxu0  ;;  %v1089_v8 = vpop.f32.mrf.mxu1 }
 0x1f9   : > { %v1095_v14 = vadd.f32 %v1089_v8, %v1014_v9 }
 0x1fa   : > { %v1173_v12 = vpop.f32.mrf.mxu0  ;;  %v1091_v13 = vpop.f32.mrf.mxu1 }
 0x1fb   : > { %v1180_v15 = vadd.f32 %v1173_v12, %v1094_v10 }
 0x1fc   : > { %v1175_v16 = vpop.f32.mrf.mxu0  ;;  %v1092_v17 = vpop.f32.mrf.mxu1 }
 0x1fd   : > { %v1188_v18 = vadd.f32 %v1186_v11, %v1180_v15  ;;  %v1181_v19 = vadd.f32 %v1175_v16, %v1095_v14 }
 0x1fe   : > { %v1177_v20 = vpop.f32.mrf.mxu0 }
 0x1ff   : > { %vm1190_vm0 = vcmp.ge.f32.partialorder %v1188_v18, 0.0  ;;  %v1192_v21 = vmul.f32 0.1, %v1188_v18  ;;  %v1189_v23 = vadd.f32 %v1186_v11, %v1181_v19 }
 0x200   : > { %v1178_v24 = vpop.f32.mrf.mxu0 }
 0x201   : > { %v1194_v25 = vsel %vm1190_vm0, %v1188_v18, %v1192_v21  ;;  %vm1191_vm1 = vcmp.ge.f32.partialorder %v1189_v23, 0.0  ;;  %v1193_v26 = vmul.f32 0.1, %v1189_v23 }
 0x202   : > { %1196 = vst [vmem:[%s345_s29] sm:$0xff] %v1194_v25 }
 0x203   : > { %v1195_v27 = vsel %vm1191_vm1, %v1189_v23, %v1193_v26 }
 0x204   : > { %1197 = vst [vmem:[%s345_s29 + $0x8] sm:$0xff] %v1195_v27 }
 0x205 PF: > { %s16_s23 = sadd.s32 1, %s1419_s23   ;;  %s1657_s21 = smov %s1415_s22 }
 0x206   : > { %p13_p5 = scmp.ge.s32.totalorder %s16_s23, 4   ;;  %s1658_s22 = smov %s1660_s24 }
 0x208   :  { %15 = sbr.rel (!%p13_p5) target bundleno = 2 (0x2), region = 88 }

</bundles_post_ra>
